<compile_context>
chip_gen: v7x
topology: tpu7x:2x2x1
jax: 0.10.0
libtpu: 0.0.40
codegen_flags: <defaults>
</compile_context>

<pallas_src>
import math
import numpy as np
import jax
import jax.numpy as jnp
from jax.experimental import pallas as pl
from jax.experimental.pallas import tpu as pltpu

# ---------------- model config (small, consistent with ModelArgs) ----------------
DIM = 32
N_HEADS = 4
N_KV_HEADS = 2
HEAD_DIM = DIM // N_HEADS          # 8
N_REP = N_HEADS // N_KV_HEADS      # 2
HD2 = HEAD_DIM // 2                # 4
SEQ = 8
BATCH = 2
ROWS = BATCH * SEQ                 # 16 (batch & seq collapsed)
MULTIPLE_OF = 16
NORM_EPS = 1e-5
_h = 4 * DIM
_h = int(2 * _h / 3)
HIDDEN = MULTIPLE_OF * ((_h + MULTIPLE_OF - 1) // MULTIPLE_OF)  # 96

QW = N_HEADS * HD2                 # 16 (width of one rope half of q / tiled dk)

# fused projection column offsets: [q_even | q_odd | dk_even | dk_odd | v1 | dv]
C_QE = 0
C_QO = C_QE + QW                   # 16
C_DKE = C_QO + QW                  # 32
C_DKO = C_DKE + QW                 # 48
C_V1 = C_DKO + QW                  # 64
C_DV = C_V1 + N_HEADS * HEAD_DIM   # 96
C_END = C_DV + N_HEADS * HEAD_DIM  # 128  (full lane width -> unmasked store)


# ---------------------------------- kernel ----------------------------------
def block_kernel(x_ref, cq_ref, sq_ref, anw_ref, fnw_ref, mred_ref, sel_ref,
                 wf_ref, wo_ref, w13_ref, w2_ref, out_ref):
    x = x_ref[...]                                              # (R, D) f32

    # ---- RMSNorm (attention_norm), f32 ----
    xn = x * jax.lax.rsqrt(jnp.mean(x * x, axis=-1, keepdims=True) + NORM_EPS)
    xn = (xn * anw_ref[...]).astype(jnp.bfloat16)

    # ---- single fused projection (R, 128), bf16 x bf16 -> f32 acc ----
    qkv = jnp.dot(xn, wf_ref[...], preferred_element_type=jnp.float32)
    q_e, q_o = qkv[:, C_QE:C_QO], qkv[:, C_QO:C_DKE]            # q even/odd halves (R,16)
    dk_e, dk_o = qkv[:, C_DKE:C_DKO], qkv[:, C_DKO:C_V1]        # (k_kv0 - k_kv1) halves, tiled per q-head
    v1t, dvt = qkv[:, C_V1:C_DV], qkv[:, C_DV:C_END]            # v_kv1 tiled, (v_kv0 - v_kv1) tiled (R,32)

    # ---- RoPE (interleaved pairs); halves stay separate (no concats) ----
    cq, sq = cq_ref[...], sq_ref[...]                           # (R, 16) tables, tiled per head
    q_re = q_e * cq - q_o * sq
    q_ro = q_e * sq + q_o * cq
    dk_re = dk_e * cq - dk_o * sq
    dk_ro = dk_e * sq + dk_o * cq

    # ---- per-position cross-head scores; GQA softmax collapses to a sigmoid ----
    # d_h = scale * q_rot_h . (k_rot_kv0 - k_rot_kv1)   (scale folded into Wq columns)
    prod = q_re * dk_re + q_ro * dk_ro                          # (R, 16), head blocks of HD2
    # block reduce over HD2 lanes + replicate across HEAD_DIM lanes in one bf16 MXU op
    d_rep = jnp.dot(prod.astype(jnp.bfloat16), mred_ref[...],
                    preferred_element_type=jnp.float32)         # (R, 32)
    p0 = jax.nn.sigmoid(d_rep)                                  # exact 2-way softmax weight for kv0
    o32 = v1t + p0 * dvt                                        # (R, 32), pure VPU FMA

    # ---- reproduce output.transpose(1,2).contiguous().view(B, S, -1) ----
    # one 0/1 selection matmul over the per-head row-stacked output (bf16, exact)
    o_v = jnp.concatenate(
        [o32[:, hh * HEAD_DIM:(hh + 1) * HEAD_DIM] for hh in range(N_HEADS)],
        axis=0).astype(jnp.bfloat16)                            # (N_HEADS*R, HEAD_DIM)
    stacked = jnp.dot(sel_ref[...], o_v,
                      preferred_element_type=jnp.float32)       # (N_HEADS*R, HEAD_DIM)
    attn_in = jnp.concatenate(
        [stacked[gg * ROWS:(gg + 1) * ROWS, :] for gg in range(N_HEADS)],
        axis=-1)                                                # (R, 32)

    proj = jnp.dot(attn_in.astype(jnp.bfloat16), wo_ref[...],
                   preferred_element_type=jnp.float32)
    h = x + proj                                                # residual 1 (f32)

    # ---- RMSNorm (ffn_norm) + SwiGLU FFN (W1/W3 fused) ----
    hn = h * jax.lax.rsqrt(jnp.mean(h * h, axis=-1, keepdims=True) + NORM_EPS)
    hn = (hn * fnw_ref[...]).astype(jnp.bfloat16)
    a13 = jnp.dot(hn, w13_ref[...], preferred_element_type=jnp.float32)   # (R, 2*HIDDEN)
    a, b3 = a13[:, :HIDDEN], a13[:, HIDDEN:]
    gate = (a * jax.nn.sigmoid(a)) * b3                                   # SwiGLU, f32
    f = jnp.dot(gate.astype(jnp.bfloat16), w2_ref[...],
                preferred_element_type=jnp.float32)                       # (R, D)

    out_ref[...] = h + f                                        # residual 2


# ---------------------------------- wrapper ----------------------------------
def diffusion_block_pallas(x, freqs_cos, freqs_sin, params):
    assert N_KV_HEADS == 2, "sigmoid collapse of the GQA softmax assumes 2 kv heads"
    R = ROWS
    scale = 1.0 / math.sqrt(HEAD_DIM)

    wq_t = np.asarray(params["wq"], np.float32).T     # (D, 32)
    wk_t = np.asarray(params["wk"], np.float32).T     # (D, 16)
    wv_t = np.asarray(params["wv"], np.float32).T     # (D, 16)

    # de-interleaved column orders: per head, all even pair-elements then odd
    ev = [h * HEAD_DIM + 2 * j for h in range(N_HEADS) for j in range(HD2)]
    od = [h * HEAD_DIM + 2 * j + 1 for h in range(N_HEADS) for j in range(HD2)]
    q_even = wq_t[:, ev] * scale                      # 1/sqrt(head_dim) folded in
    q_odd = wq_t[:, od] * scale
    # kv-head difference (k0 - k1), de-interleaved, tiled across query heads
    dk_e = wk_t[:, [2 * j for j in range(HD2)]] - wk_t[:, [HEAD_DIM + 2 * j for j in range(HD2)]]
    dk_o = wk_t[:, [2 * j + 1 for j in range(HD2)]] - wk_t[:, [HEAD_DIM + 2 * j + 1 for j in range(HD2)]]
    dk_e_t = np.tile(dk_e, (1, N_HEADS))
    dk_o_t = np.tile(dk_o, (1, N_HEADS))
    # v_kv1 and (v_kv0 - v_kv1), tiled across query heads
    v1_t = np.tile(wv_t[:, HEAD_DIM:2 * HEAD_DIM], (1, N_HEADS))
    dv_t = np.tile(wv_t[:, :HEAD_DIM] - wv_t[:, HEAD_DIM:2 * HEAD_DIM], (1, N_HEADS))
    wfused = jnp.asarray(
        np.concatenate([q_even, q_odd, dk_e_t, dk_o_t, v1_t, dv_t], axis=1),
        dtype=jnp.bfloat16)                           # (D, 128)

    wo_t = jnp.asarray(np.asarray(params["wo"], np.float32).T, dtype=jnp.bfloat16)   # (32, D)
    w13 = jnp.asarray(
        np.concatenate([np.asarray(params["w1"], np.float32).T,
                        np.asarray(params["w3"], np.float32).T], axis=1),
        dtype=jnp.bfloat16)                           # (D, 2*HIDDEN)
    w2_t = jnp.asarray(np.asarray(params["w2"], np.float32).T, dtype=jnp.bfloat16)   # (HIDDEN, D)
    attn_w = jnp.asarray(params["attn_norm"]).reshape(1, DIM).astype(jnp.float32)
    ffn_w = jnp.asarray(params["ffn_norm"]).reshape(1, DIM).astype(jnp.float32)

    # per-row (batch*seq collapsed) cos/sin tables, tiled over heads
    cos_np = np.asarray(freqs_cos, dtype=np.float32)  # (S, HD2)
    sin_np = np.asarray(freqs_sin, dtype=np.float32)
    cq = jnp.asarray(np.tile(cos_np, (BATCH, N_HEADS)))                  # (R, 16)
    sq = jnp.asarray(np.tile(sin_np, (BATCH, N_HEADS)))

    # per-head score reduce + HEAD_DIM-lane replicate matrix (0/1 -> exact in bf16)
    mred_np = np.zeros((N_HEADS * HD2, N_HEADS * HEAD_DIM), np.float32)
    for c in range(N_HEADS * HD2):
        for col in range(N_HEADS * HEAD_DIM):
            if col // HEAD_DIM == c // HD2:
                mred_np[c, col] = 1.0
    mred = jnp.asarray(mred_np, dtype=jnp.bfloat16)

    # relayout selection reproducing output.transpose(1,2).view(B, S, -1)
    # (single stacked 0/1 matrix -> one matmul; exact in bf16)
    selcat_np = np.zeros((N_HEADS * R, N_HEADS * R), np.float32)
    for b in range(BATCH):
        for s_out in range(SEQ):
            r_out = b * SEQ + s_out
            for g in range(N_HEADS):                   # column group of HEAD_DIM lanes
                m = s_out * N_HEADS + g
                h_src, s_src = m // SEQ, m % SEQ
                selcat_np[g * R + r_out, h_src * R + b * SEQ + s_src] = 1.0
    selcat = jnp.asarray(selcat_np, dtype=jnp.bfloat16)

    x2 = x.reshape(R, DIM)   # collapse (B, S) -> rows; free metadata reshape

    def const(shape):
        zeros = (0,) * len(shape)
        return pl.BlockSpec(shape, lambda i, z=zeros: z)

    grid_spec = pltpu.PrefetchScalarGridSpec(
        num_scalar_prefetch=0,
        grid=(1,),                                  # B*S=16 rows fit one step; a bigger
        in_specs=[                                  # workload would block rows here (parallel axis)
            const((R, DIM)),                        # x (rows = B*S)
            const((R, QW)),                         # cos table (tiled per head)
            const((R, QW)),                         # sin table
            const((1, DIM)),                        # attn_norm weight
            const((1, DIM)),                        # ffn_norm weight
            const((N_HEADS * HD2, N_HEADS * HEAD_DIM)),   # score reduce/replicate matrix, bf16
            const((N_HEADS * R, N_HEADS * R)),      # relayout selection matrix, bf16
            const((DIM, C_END)),                    # fused qkv weight (128 cols), bf16
            const((N_HEADS * HEAD_DIM, DIM)),       # wo^T, bf16
            const((DIM, 2 * HIDDEN)),               # [w1^T | w3^T], bf16
            const((HIDDEN, DIM)),                   # w2^T, bf16
        ],
        out_specs=pl.BlockSpec((R, DIM), lambda i: (0, 0)),
    )

    fn = pl.pallas_call(
        block_kernel,
        out_shape=jax.ShapeDtypeStruct((R, DIM), jnp.float32),
        grid_spec=grid_spec,
        compiler_params=pltpu.CompilerParams(dimension_semantics=("arbitrary",)),
    )
    out = fn(x2, cq, sq, attn_w, ffn_w, mred, selcat, wfused, wo_t, w13, w2_t)
    return out.reshape(BATCH, SEQ, DIM)


# ----------------------- pure-JAX reference (mirrors PyTorch) -----------------------
def ref_block(x, cos, sin, p):
    def rmsnorm(t, w):
        return t * jax.lax.rsqrt(jnp.mean(t * t, -1, keepdims=True) + NORM_EPS) * w

    B, S, D = x.shape
    xn = rmsnorm(x, p["attn_norm"])
    xq = (xn @ p["wq"].T).reshape(B, S, N_HEADS, HEAD_DIM)
    xk = (xn @ p["wk"].T).reshape(B, S, N_KV_HEADS, HEAD_DIM)
    xv = (xn @ p["wv"].T).reshape(B, S, N_KV_HEADS, HEAD_DIM)

    def rope(t):  # interleaved pairs, as torch.view_as_complex
        t0, t1 = t[..., 0::2], t[..., 1::2]
        c, s = cos[None, :, None, :], sin[None, :, None, :]
        return jnp.stack([t0 * c - t1 * s, t0 * s + t1 * c], axis=-1).reshape(t.shape)

    xq, xk = rope(xq), rope(xk)
    xk = jnp.repeat(xk, N_REP, axis=2)
    xv = jnp.repeat(xv, N_REP, axis=2)

    scores = jnp.einsum("bsid,bsjd->bsij", xq, xk) / math.sqrt(HEAD_DIM)
    scores = jax.nn.softmax(scores, axis=-1)
    out = jnp.einsum("bsij,bsjd->bsid", scores, xv)                   # (B,S,NH,HD)
    out = jnp.transpose(out, (0, 2, 1, 3)).reshape(B, S, N_HEADS * HEAD_DIM)
    out = out @ p["wo"].T
    h = x + out

    hn = rmsnorm(h, p["ffn_norm"])
    a, b3 = hn @ p["w1"].T, hn @ p["w3"].T
    return h + (a * jax.nn.sigmoid(a) * b3) @ p["w2"].T


# ---------------------------------- main ----------------------------------
if __name__ == "__main__":
    key = jax.random.PRNGKey(0)
    ks = jax.random.split(key, 9)
    init = lambda k, shape: (0.02 * jax.random.normal(k, shape, dtype=jnp.float32))

    params = {
        "wq": init(ks[0], (N_HEADS * HEAD_DIM, DIM)),
        "wk": init(ks[1], (N_KV_HEADS * HEAD_DIM, DIM)),
        "wv": init(ks[2], (N_KV_HEADS * HEAD_DIM, DIM)),
        "wo": init(ks[3], (DIM, N_HEADS * HEAD_DIM)),
        "w1": init(ks[4], (HIDDEN, DIM)),
        "w2": init(ks[5], (DIM, HIDDEN)),
        "w3": init(ks[6], (HIDDEN, DIM)),
        "attn_norm": jnp.ones((DIM,), jnp.float32),
        "ffn_norm": jnp.ones((DIM,), jnp.float32),
    }

    x = jax.random.normal(ks[7], (BATCH, SEQ, DIM), dtype=jnp.float32)

    # RoPE frequency tables (seq, head_dim // 2)
    inv_freq = 1.0 / (10000.0 ** (np.arange(0, HEAD_DIM, 2, dtype=np.float32) / HEAD_DIM))
    angles = np.arange(SEQ, dtype=np.float32)[:, None] * inv_freq[None, :]
    freqs_cos = jnp.asarray(np.cos(angles), dtype=jnp.float32)
    freqs_sin = jnp.asarray(np.sin(angles), dtype=jnp.float32)

    out = diffusion_block_pallas(x, freqs_cos, freqs_sin, params)
    out = jax.block_until_ready(out)

    # bf16 kernel weights vs f32 reference -> small, intentional precision gap
    ref = ref_block(x, freqs_cos, freqs_sin, params)
    np.testing.assert_allclose(np.asarray(out), np.asarray(ref), rtol=2e-3, atol=2e-3)

    print("KERNEL_OK")
</pallas_src>

<mosaic_0001>
module attributes {stable_mosaic.version = 11 : i64} {
  func.func @block_kernel(%arg0: i32, %arg1: memref<16x32xf32, #tpu.memory_space<vmem>>, %arg2: memref<16x16xf32, #tpu.memory_space<vmem>>, %arg3: memref<16x16xf32, #tpu.memory_space<vmem>>, %arg4: memref<1x32xf32, #tpu.memory_space<vmem>>, %arg5: memref<1x32xf32, #tpu.memory_space<vmem>>, %arg6: memref<16x32xbf16, #tpu.memory_space<vmem>>, %arg7: memref<64x64xbf16, #tpu.memory_space<vmem>>, %arg8: memref<32x128xbf16, #tpu.memory_space<vmem>>, %arg9: memref<32x32xbf16, #tpu.memory_space<vmem>>, %arg10: memref<32x192xbf16, #tpu.memory_space<vmem>>, %arg11: memref<96x32xbf16, #tpu.memory_space<vmem>>, %arg12: memref<16x32xf32, #tpu.memory_space<vmem>>) attributes {dimension_semantics = [#tpu.dimension_semantics<arbitrary>], iteration_bounds = array<i64: 1>, scalar_prefetch = 0 : i64, scratch_operands = 0 : i64, tpu.core_type = #tpu.core_type<tc>, window_params = [{pipeline_mode = #tpu.pipeline_mode<synchronous>, transform_indices = @transform_0, window_bounds = array<i64: 16, 32>}, {pipeline_mode = #tpu.pipeline_mode<synchronous>, transform_indices = @transform_1, window_bounds = array<i64: 16, 16>}, {pipeline_mode = #tpu.pipeline_mode<synchronous>, transform_indices = @transform_2, window_bounds = array<i64: 16, 16>}, {pipeline_mode = #tpu.pipeline_mode<synchronous>, transform_indices = @transform_3, window_bounds = array<i64: 1, 32>}, {pipeline_mode = #tpu.pipeline_mode<synchronous>, transform_indices = @transform_4, window_bounds = array<i64: 1, 32>}, {pipeline_mode = #tpu.pipeline_mode<synchronous>, transform_indices = @transform_5, window_bounds = array<i64: 16, 32>}, {pipeline_mode = #tpu.pipeline_mode<synchronous>, transform_indices = @transform_6, window_bounds = array<i64: 64, 64>}, {pipeline_mode = #tpu.pipeline_mode<synchronous>, transform_indices = @transform_7, window_bounds = array<i64: 32, 128>}, {pipeline_mode = #tpu.pipeline_mode<synchronous>, transform_indices = @transform_8, window_bounds = array<i64: 32, 32>}, {pipeline_mode = #tpu.pipeline_mode<synchronous>, transform_indices = @transform_9, window_bounds = array<i64: 32, 192>}, {pipeline_mode = #tpu.pipeline_mode<synchronous>, transform_indices = @transform_10, window_bounds = array<i64: 96, 32>}, {pipeline_mode = #tpu.pipeline_mode<synchronous>, transform_indices = @transform_11, window_bounds = array<i64: 16, 32>}]} {
    %c0 = arith.constant 0 : index
    %c0_0 = arith.constant 0 : index
    %0 = vector.load %arg1[%c0, %c0_0] : memref<16x32xf32, #tpu.memory_space<vmem>>, vector<16x32xf32>
    %1 = arith.mulf %0, %0 : vector<16x32xf32>
    %cst = arith.constant dense<0.000000e+00> : vector<16xf32>
    %2 = vector.multi_reduction <add>, %1, %cst [1] : vector<16x32xf32> to vector<16xf32>
    %3 = vector.shape_cast %2 : vector<16xf32> to vector<16x1xf32>
    %cst_1 = arith.constant 3.200000e+01 : f32
    %4 = vector.broadcast %cst_1 : f32 to vector<16x1xf32>
    %5 = arith.divf %3, %4 : vector<16x1xf32>
    %cst_2 = arith.constant 9.99999974E-6 : f32
    %6 = vector.broadcast %cst_2 : f32 to vector<16x1xf32>
    %7 = arith.addf %5, %6 : vector<16x1xf32>
    %8 = math.rsqrt %7 : vector<16x1xf32>
    %9 = vector.broadcast %8 : vector<16x1xf32> to vector<16x32xf32>
    %10 = arith.mulf %0, %9 : vector<16x32xf32>
    %c0_3 = arith.constant 0 : index
    %c0_4 = arith.constant 0 : index
    %11 = vector.load %arg4[%c0_3, %c0_4] : memref<1x32xf32, #tpu.memory_space<vmem>>, vector<1x32xf32>
    %12 = vector.broadcast %11 : vector<1x32xf32> to vector<16x32xf32>
    %13 = arith.mulf %10, %12 : vector<16x32xf32>
    %14 = arith.truncf %13 : vector<16x32xf32> to vector<16x32xbf16>
    %c0_5 = arith.constant 0 : index
    %c0_6 = arith.constant 0 : index
    %15 = vector.load %arg8[%c0_5, %c0_6] : memref<32x128xbf16, #tpu.memory_space<vmem>>, vector<32x128xbf16>
    %cst_7 = arith.constant dense<0.000000e+00> : vector<16x128xf32>
    %16 = tpu.matmul %14, %15, %cst_7 {dimension_numbers = #tpu.dot_dimension_numbers<[1], [0], [0], [1], [0, 0, 1, 1], [], []>} : vector<16x32xbf16>, vector<32x128xbf16>, vector<16x128xf32> -> vector<16x128xf32>
    %17 = vector.extract_strided_slice %16 {offsets = [0, 0], sizes = [16, 16], strides = [1, 1]} : vector<16x128xf32> to vector<16x16xf32>
    %18 = vector.extract_strided_slice %16 {offsets = [0, 16], sizes = [16, 16], strides = [1, 1]} : vector<16x128xf32> to vector<16x16xf32>
    %19 = vector.extract_strided_slice %16 {offsets = [0, 32], sizes = [16, 16], strides = [1, 1]} : vector<16x128xf32> to vector<16x16xf32>
    %20 = vector.extract_strided_slice %16 {offsets = [0, 48], sizes = [16, 16], strides = [1, 1]} : vector<16x128xf32> to vector<16x16xf32>
    %21 = vector.extract_strided_slice %16 {offsets = [0, 64], sizes = [16, 32], strides = [1, 1]} : vector<16x128xf32> to vector<16x32xf32>
    %22 = vector.extract_strided_slice %16 {offsets = [0, 96], sizes = [16, 32], strides = [1, 1]} : vector<16x128xf32> to vector<16x32xf32>
    %c0_8 = arith.constant 0 : index
    %c0_9 = arith.constant 0 : index
    %23 = vector.load %arg2[%c0_8, %c0_9] : memref<16x16xf32, #tpu.memory_space<vmem>>, vector<16x16xf32>
    %c0_10 = arith.constant 0 : index
    %c0_11 = arith.constant 0 : index
    %24 = vector.load %arg3[%c0_10, %c0_11] : memref<16x16xf32, #tpu.memory_space<vmem>>, vector<16x16xf32>
    %25 = arith.mulf %17, %23 : vector<16x16xf32>
    %26 = arith.mulf %18, %24 : vector<16x16xf32>
    %27 = arith.subf %25, %26 : vector<16x16xf32>
    %28 = arith.mulf %17, %24 : vector<16x16xf32>
    %29 = arith.mulf %18, %23 : vector<16x16xf32>
    %30 = arith.addf %28, %29 : vector<16x16xf32>
    %31 = arith.mulf %19, %23 : vector<16x16xf32>
    %32 = arith.mulf %20, %24 : vector<16x16xf32>
    %33 = arith.subf %31, %32 : vector<16x16xf32>
    %34 = arith.mulf %19, %24 : vector<16x16xf32>
    %35 = arith.mulf %20, %23 : vector<16x16xf32>
    %36 = arith.addf %34, %35 : vector<16x16xf32>
    %37 = arith.mulf %27, %33 : vector<16x16xf32>
    %38 = arith.mulf %30, %36 : vector<16x16xf32>
    %39 = arith.addf %37, %38 : vector<16x16xf32>
    %40 = arith.truncf %39 : vector<16x16xf32> to vector<16x16xbf16>
    %c0_12 = arith.constant 0 : index
    %c0_13 = arith.constant 0 : index
    %41 = vector.load %arg6[%c0_12, %c0_13] : memref<16x32xbf16, #tpu.memory_space<vmem>>, vector<16x32xbf16>
    %cst_14 = arith.constant dense<0.000000e+00> : vector<16x32xf32>
    %42 = tpu.matmul %40, %41, %cst_14 {dimension_numbers = #tpu.dot_dimension_numbers<[1], [0], [0], [1], [0, 0, 1, 1], [], []>} : vector<16x16xbf16>, vector<16x32xbf16>, vector<16x32xf32> -> vector<16x32xf32>
    %43 = arith.negf %42 : vector<16x32xf32>
    %44 = math.exp %43 : vector<16x32xf32>
    %cst_15 = arith.constant 1.000000e+00 : f32
    %45 = vector.broadcast %cst_15 : f32 to vector<16x32xf32>
    %46 = arith.addf %45, %44 : vector<16x32xf32>
    %47 = arith.divf %45, %46 : vector<16x32xf32>
    %48 = arith.mulf %47, %22 : vector<16x32xf32>
    %49 = arith.addf %21, %48 : vector<16x32xf32>
    %50 = vector.extract_strided_slice %49 {offsets = [0, 0], sizes = [16, 8], strides = [1, 1]} : vector<16x32xf32> to vector<16x8xf32>
    %51 = vector.extract_strided_slice %49 {offsets = [0, 8], sizes = [16, 8], strides = [1, 1]} : vector<16x32xf32> to vector<16x8xf32>
    %52 = vector.extract_strided_slice %49 {offsets = [0, 16], sizes = [16, 8], strides = [1, 1]} : vector<16x32xf32> to vector<16x8xf32>
    %53 = vector.extract_strided_slice %49 {offsets = [0, 24], sizes = [16, 8], strides = [1, 1]} : vector<16x32xf32> to vector<16x8xf32>
    %54 = tpu.concatenate %50, %51, %52, %53 in 0 : vector<16x8xf32>, vector<16x8xf32>, vector<16x8xf32>, vector<16x8xf32> -> vector<64x8xf32>
    %55 = arith.truncf %54 : vector<64x8xf32> to vector<64x8xbf16>
    %c0_16 = arith.constant 0 : index
    %c0_17 = arith.constant 0 : index
    %56 = vector.load %arg7[%c0_16, %c0_17] : memref<64x64xbf16, #tpu.memory_space<vmem>>, vector<64x64xbf16>
    %cst_18 = arith.constant dense<0.000000e+00> : vector<64x8xf32>
    %57 = tpu.matmul %56, %55, %cst_18 {dimension_numbers = #tpu.dot_dimension_numbers<[1], [0], [0], [1], [0, 0, 1, 1], [], []>} : vector<64x64xbf16>, vector<64x8xbf16>, vector<64x8xf32> -> vector<64x8xf32>
    %58 = vector.extract_strided_slice %57 {offsets = [0, 0], sizes = [16, 8], strides = [1, 1]} : vector<64x8xf32> to vector<16x8xf32>
    %59 = vector.extract_strided_slice %57 {offsets = [16, 0], sizes = [16, 8], strides = [1, 1]} : vector<64x8xf32> to vector<16x8xf32>
    %60 = vector.extract_strided_slice %57 {offsets = [32, 0], sizes = [16, 8], strides = [1, 1]} : vector<64x8xf32> to vector<16x8xf32>
    %61 = vector.extract_strided_slice %57 {offsets = [48, 0], sizes = [16, 8], strides = [1, 1]} : vector<64x8xf32> to vector<16x8xf32>
    %62 = tpu.concatenate %58, %59, %60, %61 in 1 : vector<16x8xf32>, vector<16x8xf32>, vector<16x8xf32>, vector<16x8xf32> -> vector<16x32xf32>
    %63 = arith.truncf %62 : vector<16x32xf32> to vector<16x32xbf16>
    %c0_19 = arith.constant 0 : index
    %c0_20 = arith.constant 0 : index
    %64 = vector.load %arg9[%c0_19, %c0_20] : memref<32x32xbf16, #tpu.memory_space<vmem>>, vector<32x32xbf16>
    %cst_21 = arith.constant dense<0.000000e+00> : vector<16x32xf32>
    %65 = tpu.matmul %63, %64, %cst_21 {dimension_numbers = #tpu.dot_dimension_numbers<[1], [0], [0], [1], [0, 0, 1, 1], [], []>} : vector<16x32xbf16>, vector<32x32xbf16>, vector<16x32xf32> -> vector<16x32xf32>
    %66 = arith.addf %0, %65 : vector<16x32xf32>
    %67 = arith.mulf %66, %66 : vector<16x32xf32>
    %cst_22 = arith.constant dense<0.000000e+00> : vector<16xf32>
    %68 = vector.multi_reduction <add>, %67, %cst_22 [1] : vector<16x32xf32> to vector<16xf32>
    %69 = vector.shape_cast %68 : vector<16xf32> to vector<16x1xf32>
    %cst_23 = arith.constant 3.200000e+01 : f32
    %70 = vector.broadcast %cst_23 : f32 to vector<16x1xf32>
    %71 = arith.divf %69, %70 : vector<16x1xf32>
    %cst_24 = arith.constant 9.99999974E-6 : f32
    %72 = vector.broadcast %cst_24 : f32 to vector<16x1xf32>
    %73 = arith.addf %71, %72 : vector<16x1xf32>
    %74 = math.rsqrt %73 : vector<16x1xf32>
    %75 = vector.broadcast %74 : vector<16x1xf32> to vector<16x32xf32>
    %76 = arith.mulf %66, %75 : vector<16x32xf32>
    %c0_25 = arith.constant 0 : index
    %c0_26 = arith.constant 0 : index
    %77 = vector.load %arg5[%c0_25, %c0_26] : memref<1x32xf32, #tpu.memory_space<vmem>>, vector<1x32xf32>
    %78 = vector.broadcast %77 : vector<1x32xf32> to vector<16x32xf32>
    %79 = arith.mulf %76, %78 : vector<16x32xf32>
    %80 = arith.truncf %79 : vector<16x32xf32> to vector<16x32xbf16>
    %c0_27 = arith.constant 0 : index
    %c0_28 = arith.constant 0 : index
    %81 = vector.load %arg10[%c0_27, %c0_28] : memref<32x192xbf16, #tpu.memory_space<vmem>>, vector<32x192xbf16>
    %cst_29 = arith.constant dense<0.000000e+00> : vector<16x192xf32>
    %82 = tpu.matmul %80, %81, %cst_29 {dimension_numbers = #tpu.dot_dimension_numbers<[1], [0], [0], [1], [0, 0, 1, 1], [], []>} : vector<16x32xbf16>, vector<32x192xbf16>, vector<16x192xf32> -> vector<16x192xf32>
    %83 = vector.extract_strided_slice %82 {offsets = [0, 0], sizes = [16, 96], strides = [1, 1]} : vector<16x192xf32> to vector<16x96xf32>
    %84 = vector.extract_strided_slice %82 {offsets = [0, 96], sizes = [16, 96], strides = [1, 1]} : vector<16x192xf32> to vector<16x96xf32>
    %85 = arith.negf %83 : vector<16x96xf32>
    %86 = math.exp %85 : vector<16x96xf32>
    %cst_30 = arith.constant 1.000000e+00 : f32
    %87 = vector.broadcast %cst_30 : f32 to vector<16x96xf32>
    %88 = arith.addf %87, %86 : vector<16x96xf32>
    %89 = arith.divf %87, %88 : vector<16x96xf32>
    %90 = arith.mulf %83, %89 : vector<16x96xf32>
    %91 = arith.mulf %90, %84 : vector<16x96xf32>
    %92 = arith.truncf %91 : vector<16x96xf32> to vector<16x96xbf16>
    %c0_31 = arith.constant 0 : index
    %c0_32 = arith.constant 0 : index
    %93 = vector.load %arg11[%c0_31, %c0_32] : memref<96x32xbf16, #tpu.memory_space<vmem>>, vector<96x32xbf16>
    %cst_33 = arith.constant dense<0.000000e+00> : vector<16x32xf32>
    %94 = tpu.matmul %92, %93, %cst_33 {dimension_numbers = #tpu.dot_dimension_numbers<[1], [0], [0], [1], [0, 0, 1, 1], [], []>} : vector<16x96xbf16>, vector<96x32xbf16>, vector<16x32xf32> -> vector<16x32xf32>
    %95 = arith.addf %66, %94 : vector<16x32xf32>
    %c0_34 = arith.constant 0 : index
    %c0_35 = arith.constant 0 : index
    %96 = vector.load %arg12[%c0_34, %c0_35] : memref<16x32xf32, #tpu.memory_space<vmem>>, vector<16x32xf32>
    tpu.vector_store %arg12[%c0_34, %c0_35], %95 {strides = array<i32>} : memref<16x32xf32, #tpu.memory_space<vmem>>, vector<16x32xf32>,
    return
  }
  func.func @transform_0(%arg0: i32) -> (i32, i32) {
    %c0_i32 = arith.constant 0 : i32
    %c0_i32_0 = arith.constant 0 : i32
    %c0_i32_1 = arith.constant 0 : i32
    return %c0_i32, %c0_i32_0 : i32, i32
  }
  func.func @transform_1(%arg0: i32) -> (i32, i32) {
    %c0_i32 = arith.constant 0 : i32
    %c0_i32_0 = arith.constant 0 : i32
    %c0_i32_1 = arith.constant 0 : i32
    return %c0_i32, %c0_i32_0 : i32, i32
  }
  func.func @transform_2(%arg0: i32) -> (i32, i32) {
    %c0_i32 = arith.constant 0 : i32
    %c0_i32_0 = arith.constant 0 : i32
    %c0_i32_1 = arith.constant 0 : i32
    return %c0_i32, %c0_i32_0 : i32, i32
  }
  func.func @transform_3(%arg0: i32) -> (i32, i32) {
    %c0_i32 = arith.constant 0 : i32
    %c0_i32_0 = arith.constant 0 : i32
    %c0_i32_1 = arith.constant 0 : i32
    return %c0_i32, %c0_i32_0 : i32, i32
  }
  func.func @transform_4(%arg0: i32) -> (i32, i32) {
    %c0_i32 = arith.constant 0 : i32
    %c0_i32_0 = arith.constant 0 : i32
    %c0_i32_1 = arith.constant 0 : i32
    return %c0_i32, %c0_i32_0 : i32, i32
  }
  func.func @transform_5(%arg0: i32) -> (i32, i32) {
    %c0_i32 = arith.constant 0 : i32
    %c0_i32_0 = arith.constant 0 : i32
    %c0_i32_1 = arith.constant 0 : i32
    return %c0_i32, %c0_i32_0 : i32, i32
  }
  func.func @transform_6(%arg0: i32) -> (i32, i32) {
    %c0_i32 = arith.constant 0 : i32
    %c0_i32_0 = arith.constant 0 : i32
    %c0_i32_1 = arith.constant 0 : i32
    return %c0_i32, %c0_i32_0 : i32, i32
  }
  func.func @transform_7(%arg0: i32) -> (i32, i32) {
    %c0_i32 = arith.constant 0 : i32
    %c0_i32_0 = arith.constant 0 : i32
    %c0_i32_1 = arith.constant 0 : i32
    return %c0_i32, %c0_i32_0 : i32, i32
  }
  func.func @transform_8(%arg0: i32) -> (i32, i32) {
    %c0_i32 = arith.constant 0 : i32
    %c0_i32_0 = arith.constant 0 : i32
    %c0_i32_1 = arith.constant 0 : i32
    return %c0_i32, %c0_i32_0 : i32, i32
  }
  func.func @transform_9(%arg0: i32) -> (i32, i32) {
    %c0_i32 = arith.constant 0 : i32
    %c0_i32_0 = arith.constant 0 : i32
    %c0_i32_1 = arith.constant 0 : i32
    return %c0_i32, %c0_i32_0 : i32, i32
  }
  func.func @transform_10(%arg0: i32) -> (i32, i32) {
    %c0_i32 = arith.constant 0 : i32
    %c0_i32_0 = arith.constant 0 : i32
    %c0_i32_1 = arith.constant 0 : i32
    return %c0_i32, %c0_i32_0 : i32, i32
  }
  func.func @transform_11(%arg0: i32) -> (i32, i32) {
    %c0_i32 = arith.constant 0 : i32
    %c0_i32_0 = arith.constant 0 : i32
    %c0_i32_1 = arith.constant 0 : i32
    return %c0_i32, %c0_i32_0 : i32, i32
  }
}

</mosaic_0001>

<bundles_post_ra>
// kernel: tpu_custom_call.1
= control target key start
LH: loop header
LB: loop body
LE: loop exit
PB: predicated region body
PF: predicated region fallthrough
CT: control target
= control target key end

     0   :  { %16 = vsyncpa [#allocation3], 0  ;;  %s1618_s0 = inlined_call_operand.hbm [shape: f32[16,32], index: 0, kind: input, shape index: {}]   ;;  %s1619_s1 = inlined_call_operand.hbm [shape: f32[16,16], index: 1, kind: input, shape index: {}]   ;;  %s1620_s2 = inlined_call_operand.hbm [shape: f32[16,16], index: 2, kind: input, shape index: {}]   ;;  %s1621_s3 = inlined_call_operand.vmem [shape: f32[1,32], index: 3, kind: input, shape index: {}]   ;;  %s1622_s4 = inlined_call_operand.vmem [shape: f32[1,32], index: 4, kind: input, shape index: {}]   ;;  %s1623_s5 = inlined_call_operand.hbm [shape: bf16[16,32], index: 5, kind: input, shape index: {}]   ;;  %s1624_s6 = inlined_call_operand.vmem [shape: bf16[64,64], index: 6, kind: input, shape index: {}]   ;;  %s1625_s7 = inlined_call_operand.vmem [shape: bf16[32,128], index: 7, kind: input, shape index: {}]   ;;  %s1626_s8 = inlined_call_operand.hbm [shape: bf16[32,32], index: 8, kind: input, shape index: {}]   ;;  %s1627_s9 = inlined_call_operand.vmem [shape: bf16[32,192], index: 9, kind: input, shape index: {}]   ;;  %s1628_s10 = inlined_call_operand.vmem [shape: bf16[96,32], index: 10, kind: input, shape index: {}]   ;;  %s1629_s11 = inlined_call_operand.hbm [shape: f32[16,32], index: 11, kind: output, shape index: {}]  }
   0x1   :  { %17 = vsyncpa [#allocation6], 0 }
   0x2   :  { %18 = vsyncpa [#allocation9], 0 }
   0x3   :  { %19 = vsyncpa [#allocation4], 0  ;;  %s1239_s17 = smov [#allocation5]   ;;  %s1240_s19 = smov [#allocation8]  }
   0x4   :  { %s37_s18 = sshll.u32 %s1239_s17, 4  ;;  %s65_s20 = sshll.u32 %s1240_s19, 4  ;;  %s38_s18 = int_to_ptr.vmem [resolvable:$true] %s37_s18  ;;  %s1320_s20 = int_to_ptr.vmem [resolvable:$true] %s65_s20 }
   0x5   :  { %s1099_s23 = scalar_lea.hbm %s1619_s1, 256 }
   0x6   :  { %p1100_p0 = scmp.ne.s32.totalorder %s1619_s1, %s1099_s23  ;;  %p1103_p1 = scmp.lt.u32.totalorder %s1099_s23, %s1619_s1 }
   0x8   :  { %p1105_p2 = pnand %p1103_p1, %p1100_p0 }
   0xa   :  { %1108 = shalt.err (!%p1105_p2)
}
   0xb   :  { %s1109_s28 = scalar_lea.vmem %s38_s18, 256  ;;  %p1114_p4 = scmp.lt.s32.totalorder %s38_s18, %s38_s18 }
   0xc   :  { %p1110_p3 = scmp.ne.s32.totalorder %s38_s18, %s1109_s28  ;;  %p1115_p5 = scmp.lt.s32.totalorder %s1109_s28, %s1109_s28 }
   0xe   :  { %p1116_p6 = por %p1115_p5, %p1114_p4 }
  0x10   :  { %p1117_p7 = pnand %p1116_p6, %p1110_p3 }
  0x12   :  { %1120 = shalt.err (!%p1117_p7)
}
  0x13   :  { %s1241_s29 = smov 128   ;;  %s1242_s30 = smov 8  }
  0x14   :  { %43 = dma.hbm_to_vmem [thread:$0]  %s1619_s1, 256, %s38_s18, [#allocation6], %s1241_s29, %s1241_s29, %s1242_s30  }
  0x15   :  { %s1121_s16 = scalar_lea.hbm %s1623_s5, 128 }
  0x16   :  { %p1122_p8 = scmp.ne.s32.totalorder %s1623_s5, %s1121_s16  ;;  %p1125_p9 = scmp.lt.u32.totalorder %s1121_s16, %s1623_s5 }
  0x18   :  { %p1127_p10 = pnand %p1125_p9, %p1122_p8 }
  0x1a   :  { %1130 = shalt.err (!%p1127_p10)
}
  0x1b   :  { %s1131_s23 = scalar_lea.vmem %s1320_s20, 128  ;;  %p1136_p12 = scmp.lt.s32.totalorder %s1320_s20, %s1320_s20 }
  0x1c   :  { %p1132_p11 = scmp.ne.s32.totalorder %s1320_s20, %s1131_s23  ;;  %p1137_p13 = scmp.lt.s32.totalorder %s1131_s23, %s1131_s23 }
  0x1e   :  { %p1138_p0 = por %p1137_p13, %p1136_p12 }
  0x20   :  { %p1139_p1 = pnand %p1138_p0, %p1132_p11 }
  0x22   :  { %1142 = shalt.err (!%p1139_p1)
}
  0x23   :  { %s1243_s1 = smov 64   ;;  %s1244_s18 = smov 4  }
  0x24   :  { %71 = dma.hbm_to_vmem [thread:$0]  %s1623_s5, 128, %s1320_s20, [#allocation9], %s1243_s1, %s1243_s1, %s1244_s18  }
  0x25   :  { %s1245_s26 = smov [#allocation2]   ;;  %s1246_s28 = smov [#allocation7]  }
  0x26   :  { %s25_s27 = sshll.u32 %s1245_s26, 4  ;;  %s49_s12 = sshll.u32 %s1246_s28, 4  ;;  %s26_s27 = int_to_ptr.vmem [resolvable:$true] %s25_s27  ;;  %s1357_s12 = int_to_ptr.vmem [resolvable:$true] %s49_s12 }
  0x27   :  { %s1143_s15 = scalar_lea.hbm %s1618_s0, 256 }
  0x28   :  { %p1144_p2 = scmp.ne.s32.totalorder %s1618_s0, %s1143_s15  ;;  %p1147_p3 = scmp.lt.u32.totalorder %s1143_s15, %s1618_s0 }
  0x2a   :  { %p1149_p4 = pnand %p1147_p3, %p1144_p2 }
  0x2c   :  { %1152 = shalt.err (!%p1149_p4)
}
  0x2d   :  { %s1153_s5 = scalar_lea.vmem %s26_s27, 256  ;;  %p1158_p6 = scmp.lt.s32.totalorder %s26_s27, %s26_s27 }
  0x2e   :  { %p1154_p5 = scmp.ne.s32.totalorder %s26_s27, %s1153_s5  ;;  %p1159_p7 = scmp.lt.s32.totalorder %s1153_s5, %s1153_s5 }
  0x30   :  { %p1160_p8 = por %p1159_p7, %p1158_p6 }
  0x32   :  { %p1161_p9 = pnand %p1160_p8, %p1154_p5 }
  0x34   :  { %1164 = shalt.err (!%p1161_p9)
}
  0x35   :  { %31 = dma.hbm_to_vmem [thread:$0]  %s1618_s0, 256, %s26_s27, [#allocation3], %s1241_s29, %s1241_s29, %s1242_s30  }
  0x36   :  { %s1165_s25 = scalar_lea.hbm %s1620_s2, 256 }
  0x37   :  { %p1166_p10 = scmp.ne.s32.totalorder %s1620_s2, %s1165_s25  ;;  %p1169_p11 = scmp.lt.u32.totalorder %s1165_s25, %s1620_s2 }
  0x39   :  { %p1171_p12 = pnand %p1169_p11, %p1166_p10 }
  0x3b   :  { %1174 = shalt.err (!%p1171_p12)
}
  0x3c   :  { %s1175_s15 = scalar_lea.vmem %s1357_s12, 256  ;;  %p1180_p0 = scmp.lt.s32.totalorder %s1357_s12, %s1357_s12 }
  0x3d   :  { %p1176_p13 = scmp.ne.s32.totalorder %s1357_s12, %s1175_s15  ;;  %p1181_p1 = scmp.lt.s32.totalorder %s1175_s15, %s1175_s15 }
  0x3f   :  { %p1182_p2 = por %p1181_p1, %p1180_p0 }
  0x41   :  { %p1183_p3 = pnand %p1182_p2, %p1176_p13 }
  0x43   :  { %1186 = shalt.err (!%p1183_p3)
}
  0x44   :  { %55 = dma.hbm_to_vmem [thread:$0]  %s1620_s2, 256, %s1357_s12, [#allocation6], %s1241_s29, %s1241_s29, %s1242_s30  }
  0x45   :  { %s1247_s16 = smov [#allocation10]   ;;  %s1187_s5 = scalar_lea.hbm %s1626_s8, 256 }
  0x46   :  { %s81_s17 = sshll.u32 %s1247_s16, 4  ;;  %p1188_p4 = scmp.ne.s32.totalorder %s1626_s8, %s1187_s5  ;;  %s82_s17 = int_to_ptr.vmem [resolvable:$true] %s81_s17 }
  0x47   :  { %p1191_p5 = scmp.lt.u32.totalorder %s1187_s5, %s1626_s8 }
  0x49   :  { %p1193_p6 = pnand %p1191_p5, %p1188_p4 }
  0x4b   :  { %1196 = shalt.err (!%p1193_p6)
}
  0x4c   :  { %s1197_s25 = scalar_lea.vmem %s82_s17, 256  ;;  %p1202_p8 = scmp.lt.s32.totalorder %s82_s17, %s82_s17 }
  0x4d   :  { %p1198_p7 = scmp.ne.s32.totalorder %s82_s17, %s1197_s25  ;;  %p1203_p9 = scmp.lt.s32.totalorder %s1197_s25, %s1197_s25 }
  0x4f   :  { %p1204_p10 = por %p1203_p9, %p1202_p8 }
  0x51   :  { %p1205_p11 = pnand %p1204_p10, %p1198_p7 }
  0x53   :  { %1208 = shalt.err (!%p1205_p11)
}
  0x54   :  { %87 = dma.hbm_to_vmem [thread:$0]  %s1626_s8, 256, %s82_s17, [#allocation9], %s1243_s1, %s1243_s1, %s1244_s18  }
  0x55   :  { %1231 = dma.done.wait [#allocation3], 256  }
  0x56   :  { %1232 = vsyncadd [#allocation3], 4294967040 }
  0x57   :  { %1233 = dma.done.wait [#allocation6], 512  }
  0x58   :  { %1234 = vsyncadd [#allocation6], 4294966784 }
  0x59   :  { %1235 = dma.done.wait [#allocation9], 384  }
  0x5a   :  { %1236 = vsyncadd [#allocation9], 4294966912  ;;  %v1409_v0 = vld [vmem:[#allocation2] sm:$0xff]  ;;  %vm112_vm0 = vcmask 261120   ;;  %v1411_v1 = vld [vmem:[#allocation2 + $0x8] sm:$0xff]  ;;  %v1248_v7 = vmov 0.0  }
  0x5b   :  { %v110_v2 = vmul.f32 %v1409_v0, %v1409_v0  ;;  %v111_v3 = vmul.f32 %v1411_v1, %v1411_v1  ;;  %v1054_v6 = vld [vmem:[%s1625_s7] sm:$0xff]   ;;  %949 = vmatprep.subr.bf16.mxu0 %v1248_v7  ;;  %vm1249_vm1 = vmmov 0   ;;  %v1055_v8 = vld [vmem:[%s1625_s7 + $0x8] sm:$0xff]   ;;  %s1250_s13 = smov 48   ;;  %v1433_v10 = vld [vmem:[#allocation5] sm:$0xff]  ;;  %s1251_s7 = smov 32  }
  0x5c   :  { %953 = vmatprep.mubr.msk.bf16.mxu0 %vm1249_vm1, %v1248_v7  ;;  %950 = vmatpush3.bf16.msra.mxu0 %v1054_v6  ;;  %v1430_v9 = vld [vmem:[#allocation7] sm:$0xff]  ;;  %v1435_v11 = vld [vmem:[#allocation7 + $0x8] sm:$0xff]  ;;  %v1439_v12 = vld [vmem:[#allocation5 + $0x8] sm:$0xff]  ;;  %s1252_s14 = smov 16   ;;  %s1254_s27 = smov 96   ;;  %vm329_vm2 = vcmask 130048  }
  0x5d   :  { %v113_v4 = vsel %vm112_vm0, %v110_v2, 0.0  ;;  %v116_v5 = vsel %vm112_vm0, %v111_v3, 0.0  ;;  %951 = vmatprep.subr.bf16.mxu0 %v1248_v7  ;;  %254 = vrot.lane.b32.xlu1 %v1430_v9, %s1250_s13  ;;  %v892_v22 = vld [vmem:[%s1621_s3] ss:$0 sm:$0xff]  ;;  %s1253_s3 = smov 112   ;;  %v1056_v50 = vld [vmem:[#allocation8] sm:$0xff]  }
  0x5e   :  { %114 = vadd.xlane.f32.xlu0 %v113_v4  ;;  %s1255_s16 = smov 120   ;;  %s1256_s17 = smov 104   ;;  %vm474_vm3 = vcmask 523264   ;;  %vm576_vm4 = vcmask 64512   ;;  %vm581_vm5 = vcmask 195584   ;;  %vm824_vm6 = vcmask 785408  }
  0x60   :  { %952 = vmatpush3.bf16.msra.mxu0 %v1055_v8 }
  0x61   :  { %957 = vmatprep.subr.bf16.mxu0 %v1248_v7  ;;  %256 = vrot.lane.b32.xlu1 %v1435_v11, %s1250_s13 }
  0x62   :  { %117 = vadd.xlane.f32.xlu0 %v116_v5 }
  0x65   :  { %282 = vrot.lane.b32.xlu1 %v1439_v12, %s1250_s13 }
  0x69   :  { %206 = vrot.lane.b32.xlu1 %v1430_v9, %s1252_s14 }
  0x6d   :  { %208 = vrot.lane.b32.xlu1 %v1435_v11, %s1252_s14 }
  0x71   :  { %228 = vrot.lane.b32.xlu1 %v1433_v10, %s1252_s14 }
  0x75   :  { %230 = vrot.lane.b32.xlu1 %v1439_v12, %s1252_s14 }
  0x78   :  { %280 = vrot.lane.b32.xlu0 %v1433_v10, %s1250_s13 }
  0x79   :  { %246 = vrot.lane.b32.xlu1 %v1433_v10, %s1251_s7 }
  0x7c   :  { %248 = vrot.lane.b32.xlu0 %v1439_v12, %s1251_s7 }
  0x7d   :  { %272 = vrot.lane.b32.xlu1 %v1430_v9, %s1251_s7 }
  0x80   :  { %274 = vrot.lane.b32.xlu0 %v1435_v11, %s1251_s7 }
  0xcf   :  { %v255_v27 = vpop.permute.xlu1 %254 }
  0xd3   :  { %v257_v28 = vpop.permute.xlu1 %256 }
  0xd7   :  { %v283_v29 = vpop.permute.xlu1 %282 }
  0xdb   :  { %v207_v30 = vpop.permute.xlu1 %206 }
  0xdf   :  { %v209_v34 = vpop.permute.xlu1 %208 }
  0xe3   :  { %v229_v41 = vpop.permute.xlu1 %228 }
  0xe7   :  { %v231_v45 = vpop.permute.xlu1 %230 }
  0xeb   :  { %v115_v13 = vpop.xlane.xlu0 %114  ;;  %v247_v47 = vpop.permute.xlu1 %246 }
  0xec   :  { %v120_v14 = vmul.f32 0.03125, %v115_v13 }
  0xee   :  { %v122_v15 = vadd.f32 1e-05, %v120_v14 }
  0xef   :  { %v118_v16 = vpop.xlane.xlu0 %117  ;;  %v273_v49 = vpop.permute.xlu1 %272 }
  0xf0   :  { %1075 = vrsqrt.f32 %v122_v15  ;;  %v121_v17 = vmul.f32 0.03125, %v118_v16 }
  0xf2   :  { %v123_v18 = vadd.f32 1e-05, %v121_v17 }
  0xf3   :  { %v281_v38 = vpop.permute.xlu0 %280 }
  0xf4   :  { %1077 = vrsqrt.f32 %v123_v18 }
  0xf7   :  { %v249_v48 = vpop.permute.xlu0 %248 }
  0xfa   :  { %v1076_v19 = vpop.eup %1075 }
  0xfb   :  { %v126_v20 = vmul.f32 %v1076_v19, %v1409_v0  ;;  %v275_v51 = vpop.permute.xlu0 %274 }
  0xfd   :  { %v135_v24 = vmul.f32 %v892_v22, %v126_v20 }
  0xfe   :  { %v1078_v21 = vpop.eup %1077 }
  0xff   :  { %v127_v23 = vmul.f32 %v1078_v21, %v1411_v1 }
 0x101   :  { %v136_v25 = vmul.f32 %v892_v22, %v127_v23 }
 0x103   :  { %v137_v26 = vpack.c.bf16 %v136_v25, %v135_v24 }
 0x105   :  { %954 = vmatmul.mubr.msk.bf16.vlgmr.msra.gmra.mrb[0].mxu0 %vm112_vm0, %v137_v26 }
 0x106   :  { %959 = vmatprep.mubr.msk.bf16.mxu0 %vm1249_vm1, %v1248_v7  ;;  %958 = vmatpush3.bf16.msra.mxu0 %v1056_v50 }
 0x107   :  { %979 = vmatprep.subr.bf16.mxu0 %v1248_v7 }
 0x1d8   :  { %v1466_v31 = vpop.f32.mrb[0].mxu0 }
 0x1d9   :  { %v955_v32 = vpop.f32.mrb[1].mxu0  ;;  %v260_v33 = vmul.f32 %v255_v27, %v1466_v31  ;;  %v286_v39 = vmul.f32 %v281_v38, %v1466_v31  ;;  %v212_v42 = vmul.f32 %v207_v30, %v1466_v31  ;;  %v234_v44 = vmul.f32 %v229_v41, %v1466_v31 }
 0x1da   :  { %v1469_v35 = vpop.f32.mrb[2].mxu0  ;;  %v252_v52 = vmul.f32 %v247_v47, %v1466_v31  ;;  %v278_v58 = vmul.f32 %v273_v49, %v1466_v31  ;;  %v224_v8 = vmul.f32 %v1430_v9, %v1466_v31  ;;  %v202_v14 = vmul.f32 %v1433_v10, %v1466_v31 }
 0x1db   :  { %264 = vrot.lane.b32.xlu1 %v260_v33, %s1253_s3  ;;  %v956_v36 = vpop.f32.mrb[3].mxu0  ;;  %v261_v37 = vmul.f32 %v257_v28, %v1469_v35  ;;  %v287_v40 = vmul.f32 %v283_v29, %v1469_v35  ;;  %v213_v43 = vmul.f32 %v209_v34, %v1469_v35  ;;  %v235_v46 = vmul.f32 %v231_v45, %v1469_v35 }
 0x1dc   :  { %v253_v55 = vmul.f32 %v249_v48, %v1469_v35  ;;  %v279_v60 = vmul.f32 %v275_v51, %v1469_v35  ;;  %v203_v15 = vmul.f32 %v1439_v12, %v1469_v35  ;;  %v225_v17 = vmul.f32 %v1435_v11, %v1469_v35 }
 0x1dd   :  { %266 = vrot.lane.b32.xlu0 %v261_v37, %s1253_s3 }
 0x1df   :  { %290 = vrot.lane.b32.xlu1 %v286_v39, %s1253_s3 }
 0x1e1   :  { %292 = vrot.lane.b32.xlu0 %v287_v40, %s1253_s3 }
 0x1e3   :  { %216 = vrot.lane.b32.xlu1 %v212_v42, %s1253_s3 }
 0x1e5   :  { %218 = vrot.lane.b32.xlu0 %v213_v43, %s1253_s3 }
 0x1e7   :  { %238 = vrot.lane.b32.xlu1 %v234_v44, %s1253_s3 }
 0x1e9   :  { %240 = vrot.lane.b32.xlu0 %v235_v46, %s1253_s3 }
 0x24d   :  { %v265_v53 = vpop.permute.xlu1 %264 }
 0x24e   :  { %v270_v54 = vsub.f32 %v252_v52, %v265_v53 }
 0x24f   :  { %v267_v56 = vpop.permute.xlu0 %266 }
 0x250   :  { %v271_v57 = vsub.f32 %v253_v55, %v267_v56  ;;  %300 = vrot.lane.b32.xlu1 %v270_v54, %s1254_s27 }
 0x251   :  { %v291_v59 = vpop.permute.xlu1 %290 }
 0x252   :  { %v296_v61 = vadd.f32 %v291_v59, %v278_v58  ;;  %302 = vrot.lane.b32.xlu0 %v271_v57, %s1254_s27 }
 0x253   :  { %v293_v62 = vpop.permute.xlu0 %292 }
 0x254   :  { %v297_v63 = vadd.f32 %v293_v62, %v279_v60  ;;  %310 = vrot.lane.b32.xlu1 %v296_v61, %s1254_s27 }
 0x255   :  { %v217_v2 = vpop.permute.xlu1 %216 }
 0x256   :  { %312 = vrot.lane.b32.xlu0 %v297_v63, %s1254_s27  ;;  %v222_v19 = vsub.f32 %v202_v14, %v217_v2 }
 0x257   :  { %v219_v3 = vpop.permute.xlu0 %218 }
 0x258   :  { %388 = vrot.lane.b32.xlu1 %v1466_v31, %s1251_s7  ;;  %v223_v20 = vsub.f32 %v203_v15, %v219_v3  ;;  %v1058_v3 = vld [vmem:[%s1624_s6 + $0x8] sm:$0xff]  }
 0x259   :  { %v239_v4 = vpop.permute.xlu1 %238 }
 0x25a   :  { %390 = vrot.lane.b32.xlu0 %v1469_v35, %s1251_s7  ;;  %v244_v16 = vadd.f32 %v239_v4, %v224_v8  ;;  %v1059_v4 = vld [vmem:[%s1624_s6 + $0x10] sm:$0xff]  }
 0x25b   :  { %v241_v5 = vpop.permute.xlu0 %240 }
 0x25c   :  { %v245_v21 = vadd.f32 %v241_v5, %v225_v17  ;;  %v1060_v5 = vld [vmem:[%s1624_s6 + $0x18] sm:$0xff]   ;;  %v1062_v17 = vld [vmem:[#allocation10 + $0x8] sm:$0xff]  }
 0x2c2   :  { %v301_v6 = vpop.permute.xlu1 %300 }
 0x2c3   :  { %v306_v24 = vmul.f32 %v301_v6, %v222_v19  ;;  %v1061_v6 = vld [vmem:[#allocation10] sm:$0xff]  }
 0x2c4   :  { %v303_v13 = vpop.permute.xlu0 %302 }
 0x2c5   :  { %v307_v25 = vmul.f32 %v303_v13, %v223_v20 }
 0x2c6   :  { %v311_v18 = vpop.permute.xlu1 %310 }
 0x2c7   :  { %v316_v22 = vmul.f32 %v311_v18, %v244_v16 }
 0x2c8   :  { %v313_v23 = vpop.permute.xlu0 %312 }
 0x2c9   :  { %v317_v9 = vmul.f32 %v313_v23, %v245_v21  ;;  %v318_v26 = vadd.f32 %v316_v22, %v306_v24 }
 0x2ca   :  { %v389_v39 = vpop.permute.xlu1 %388 }
 0x2cb   :  { %v319_v27 = vadd.f32 %v317_v9, %v307_v25 }
 0x2cc   :  { %v391_v42 = vpop.permute.xlu0 %390 }
 0x2cd   :  { %v320_v10 = vpack.c.bf16 %v319_v27, %v318_v26 }
 0x2cf   :  { %960 = vmatmul.mubr.msk.bf16.vlgmr.msra.gmra.mrb[4].mxu0 %vm329_vm2, %v320_v10 }
 0x2d0   :  { %983 = vmatprep.mubr.msk.bf16.mxu0 %vm1249_vm1, %v1248_v7  ;;  %980 = vmatpush3.bf16.msra.mxu0 %v1061_v6  ;;  %v1074_v6 = vld [vmem:[%s1628_s10 + $0x28] sm:$0xff]  }
 0x2d1   :  { %981 = vmatprep.subr.bf16.mxu0 %v1248_v7 }
 0x2d4   :  { %982 = vmatpush3.bf16.msra.mxu0 %v1062_v17 }
 0x3a2   :  { %v367_v12 = vpop.f32.mrb[4].mxu0 }
 0x3a3   :  { %v898_v11 = vmul.f32 -1.442695, %v367_v12  ;;  %v961_v28 = vpop.f32.mrb[5].mxu0 }
 0x3a4   :  { %v370_v29 = vpop.f32.mrb[6].mxu0 }
 0x3a5   :  { %1079 = vpow2.f32 %v898_v11  ;;  %v899_v30 = vmul.f32 -1.442695, %v370_v29  ;;  %v962_v32 = vpop.f32.mrb[7].mxu0 }
 0x3a7   :  { %1081 = vpow2.f32 %v899_v30 }
 0x3af   :  { %v1080_v33 = vpop.eup %1079 }
 0x3b0   :  { %v380_v34 = vadd.f32 1.0, %v1080_v33 }
 0x3b1   :  { %v1082_v36 = vpop.eup %1081 }
 0x3b2   :  { %1083 = vrcp.f32 %v380_v34  ;;  %v381_v37 = vadd.f32 1.0, %v1082_v36 }
 0x3b4   :  { %1085 = vrcp.f32 %v381_v37 }
 0x3bc   :  { %v1084_v38 = vpop.eup %1083 }
 0x3bd   :  { %v394_v40 = vmul.f32 %v1084_v38, %v389_v39 }
 0x3be   :  { %v1086_v41 = vpop.eup %1085 }
 0x3bf   :  { %398 = vrot.lane.b32.xlu1 %v394_v40, %s1243_s1  ;;  %v395_v43 = vmul.f32 %v1086_v41, %v391_v42 }
 0x3c1   :  { %400 = vrot.lane.b32.xlu0 %v395_v43, %s1243_s1 }
 0x431   :  { %v399_v44 = vpop.permute.xlu1 %398 }
 0x432   :  { %v404_v46 = vadd.f32 %v399_v44, %v1466_v31  ;;  %v1057_v31 = vld [vmem:[%s1624_s6] sm:$0xff]   ;;  %s1257_s6 = smov 24  }
 0x433   :  { %v401_v45 = vpop.permute.xlu0 %400  ;;  %971 = vmatprep.mubr.msk.bf16.mxu1 %vm474_vm3, %v1057_v31 }
 0x434   :  { %v405_v47 = vadd.f32 %v401_v45, %v1469_v35 }
 0x436   :  { %v1029_v48 = vpack.i.bf16 %v405_v47, %v404_v46  ;;  %v426_v49 = vpack.c.bf16 %v405_v47, %v404_v46 }
 0x438   :  { %1030 = vrot.lane.b32.xlu0 %v1029_v48, %s1253_s3  ;;  %1025 = vrot.lane.b32.xlu1 %v1029_v48, %s1255_s16 }
 0x43c   :  { %1035 = vrot.lane.b32.xlu1 %v1029_v48, %s1256_s17  ;;  %462 = vrot.lane.b32.xlu0 %v426_v49, %s1243_s1  ;;  %v1066_v48 = vld [vmem:[%s1627_s9 + $0x10] ss:$8 sps:$4 sm:$0xff]   ;;  %v1068_v49 = vld [vmem:[%s1627_s9 + $0x14] ss:$8 sps:$4 sm:$0xff]  }
 0x4aa   :  { %v1031_v50 = vpop.permute.xlu0 %1030  ;;  %v1026_v51 = vpop.permute.xlu1 %1025 }
 0x4ab   :  { %v1033_v52 = vunpack.i.h.bf16 %v1031_v50  ;;  %v1032_v53 = vunpack.i.l.bf16 %v1031_v50  ;;  %v1028_v54 = vunpack.i.h.bf16 %v1026_v51  ;;  %v1027_v55 = vunpack.i.l.bf16 %v1026_v51 }
 0x4ac   :  { %v1258_v50 = vmov 0  }
 0x4ad   :  { %v427_v35 = vpack.c.bf16 %v1028_v54, %v1027_v55  ;;  %v428_v56 = vpack.c.bf16 %v1033_v52, %v1032_v53 }
 0x4ae   :  { %v1036_v57 = vpop.permute.xlu1 %1035  ;;  %v463_v58 = vpop.permute.xlu0 %462 }
 0x4af   :  { %v1038_v59 = vunpack.i.h.bf16 %v1036_v57  ;;  %v1037_v60 = vunpack.i.l.bf16 %v1036_v57  ;;  %464 = vrot.lane.b32.xlu1 %v427_v35, %s1243_s1  ;;  %466 = vrot.lane.b32.xlu0 %v428_v56, %s1243_s1 }
 0x4b0   :  { %963 = vmatprep.subr.bf16.mxu1 %v463_v58 }
 0x4b1   :  { %964 = vmatpush3.bf16.msra.mxu1 %v463_v58  ;;  %v429_v61 = vpack.c.bf16 %v1038_v59, %v1037_v60  ;;  %v911_v58 = vld [vmem:[%s1622_s4] ss:$0 sm:$0xff] }
 0x4b3   :  { %468 = vrot.lane.b32.xlu1 %v429_v61, %s1243_s1 }
 0x521   :  { %v465_v62 = vpop.permute.xlu1 %464  ;;  %v467_v63 = vpop.permute.xlu0 %466 }
 0x522   :  { %965 = vmatprep.subr.bf16.mxu1 %v465_v62 }
 0x523   :  { %966 = vmatpush3.bf16.msra.mxu1 %v465_v62 }
 0x524   :  { %967 = vmatprep.subr.bf16.mxu1 %v467_v63 }
 0x525   :  { %v469_v2 = vpop.permute.xlu1 %468 }
 0x527   :  { %968 = vmatpush3.bf16.msra.mxu1 %v467_v63  ;;  %v1069_v63 = vld [vmem:[%s1628_s10] sm:$0xff]  }
 0x528   :  { %969 = vmatprep.subr.bf16.mxu1 %v469_v2 }
 0x52b   :  { %970 = vmatpush3.bf16.msra.mxu1 %v469_v2  ;;  %v1070_v2 = vld [vmem:[%s1628_s10 + $0x8] sm:$0xff]  }
 0x52c   :  { %987 = vmatprep.subr.bf16.mxu1 %v1248_v7 }
 0x52e   :  { %972 = vmatmul.mubr.msk.bf16.vlgmr.msra.gmra.mrb[0].mxu1 %vm474_vm3, %v1058_v3  ;;  %v1071_v3 = vld [vmem:[%s1628_s10 + $0x10] sm:$0xff]  }
 0x52f   :  { %975 = vmatprep.mubr.msk.bf16.mxu1 %vm474_vm3, %v1059_v4  ;;  %988 = vmatpush3.bf16.msra.mxu1 %v1069_v63  ;;  %v1072_v4 = vld [vmem:[%s1628_s10 + $0x18] sm:$0xff]  }
 0x530   :  { %989 = vmatprep.subr.bf16.mxu1 %v1248_v7 }
 0x533   :  { %990 = vmatpush3.bf16.msra.mxu1 %v1070_v2 }
 0x534   :  { %991 = vmatprep.subr.bf16.mxu1 %v1248_v7 }
 0x536   :  { %976 = vmatmul.mubr.msk.bf16.gmra.mrb[4].mxu1 %vm474_vm3, %v1060_v5  ;;  %v1073_v5 = vld [vmem:[%s1628_s10 + $0x20] sm:$0xff]   ;;  %s1259_s10 = smov [#allocation11]  }
 0x537   :  { %999 = vmatprep.mubr.msk.bf16.mxu1 %vm1249_vm1, %v1248_v7  ;;  %992 = vmatpush3.bf16.msra.mxu1 %v1071_v3 }
 0x538   :  { %993 = vmatprep.subr.bf16.mxu1 %v1248_v7 }
 0x53b   :  { %994 = vmatpush3.bf16.msra.mxu1 %v1072_v4 }
 0x53c   :  { %995 = vmatprep.subr.bf16.mxu1 %v1248_v7 }
 0x53f   :  { %996 = vmatpush3.bf16.msra.mxu1 %v1073_v5 }
 0x540   :  { %997 = vmatprep.subr.bf16.mxu1 %v1248_v7 }
 0x543   :  { %998 = vmatpush3.bf16.msra.mxu1 %v1074_v6 }
 0x601   :  { %v973_v8 = vpop.f32.mrb[0].mxu1 }
 0x602   :  { %v521_v13 = vpop.f32.mrb[1].mxu1 }
 0x603   :  { %v974_v14 = vpop.f32.mrb[2].mxu1 }
 0x604   :  { %v1039_v15 = vpack.i.bf16 %v974_v14, %v973_v8  ;;  %v524_v16 = vpop.f32.mrb[3].mxu1 }
 0x606   :  { %1040 = vrot.lane.b32.xlu0 %v1039_v15, %s1242_s30 }
 0x609   :  { %v977_v18 = vpop.f32.mrb[4].mxu1 }
 0x60a   :  { %v537_v19 = vpop.f32.mrb[5].mxu1 }
 0x60b   :  { %v978_v20 = vpop.f32.mrb[6].mxu1 }
 0x60c   :  { %v1049_v21 = vpack.i.bf16 %v978_v20, %v977_v18  ;;  %v540_v22 = vpop.f32.mrb[7].mxu1 }
 0x60d   :  { %v1044_v23 = vpack.i.bf16 %v540_v22, %v537_v19 }
 0x60e   :  { %1050 = vrot.lane.b32.xlu0 %v1049_v21, %s1257_s6 }
 0x60f   :  { %1045 = vrot.lane.b32.xlu1 %v1044_v23, %s1252_s14 }
 0x678   :  { %v1041_v24 = vpop.permute.xlu0 %1040 }
 0x679   :  { %v1043_v25 = vunpack.i.h.bf16 %v1041_v24  ;;  %v1042_v9 = vunpack.i.l.bf16 %v1041_v24 }
 0x67b   :  { %v577_v11 = vsel %vm576_vm4, %v521_v13, %v1042_v9  ;;  %v578_v28 = vsel %vm576_vm4, %v524_v16, %v1043_v25 }
 0x680   :  { %v1051_v26 = vpop.permute.xlu0 %1050 }
 0x681   :  { %v1046_v27 = vpop.permute.xlu1 %1045  ;;  %v1053_v29 = vunpack.i.h.bf16 %v1051_v26  ;;  %v1052_v30 = vunpack.i.l.bf16 %v1051_v26 }
 0x682   :  { %v1048_v10 = vunpack.i.h.bf16 %v1046_v27  ;;  %v1047_v12 = vunpack.i.l.bf16 %v1046_v27 }
 0x684   :  { %v580_v32 = vsel %vm329_vm2, %v578_v28, %v1048_v10  ;;  %v579_v33 = vsel %vm329_vm2, %v577_v11, %v1047_v12 }
 0x685   :  { %v583_v34 = vsel %vm581_vm5, %v580_v32, %v1053_v29  ;;  %v582_v36 = vsel %vm581_vm5, %v579_v33, %v1052_v30 }
 0x686   :  { %v584_v37 = vpack.c.bf16 %v583_v34, %v582_v36 }
 0x688   :  { %984 = vmatmul.mubr.msk.bf16.vlgmr.msra.gmra.mrb[8].mxu0 %vm112_vm0, %v584_v37 }
 0x689   :  { %732 = vmatprep.mubr.bf16.mxu0 %v1258_v50 }
 0x75b   :  { %v638_v38 = vpop.f32.mrb[8].mxu0 }
 0x75c   :  { %v1541_v39 = vadd.f32 %v638_v38, %v1409_v0  ;;  %v985_v40 = vpop.f32.mrb[9].mxu0  ;;  %v1065_v0 = vld [vmem:[%s1627_s9 + $0x4] ss:$8 sps:$4 sm:$0xff]  }
 0x75d   :  { %v641_v41 = vpop.f32.mrb[10].mxu0  ;;  %700 = vmatprep.subr.bf16.mxu0 %v1065_v0 }
 0x75e   :  { %v1544_v42 = vadd.f32 %v641_v41, %v1411_v1  ;;  %v986_v43 = vpop.f32.mrb[11].mxu0  ;;  %v647_v44 = vmul.f32 %v1541_v39, %v1541_v39  ;;  %v1063_v1 = vld [vmem:[%s1627_s9] ss:$8 sps:$4 sm:$0xff]  }
 0x75f   :  { %701 = vmatpush1.bf16.msra.mxu0 %v1063_v1 }
 0x760   :  { %v649_v45 = vsel %vm112_vm0, %v647_v44, 0.0  ;;  %v648_v46 = vmul.f32 %v1544_v42, %v1544_v42  ;;  %702 = vmatprep.subr.bf16.mxu0 %v1068_v49 }
 0x761   :  { %650 = vadd.xlane.f32.xlu1 %v649_v45 }
 0x762   :  { %v652_v47 = vsel %vm112_vm0, %v648_v46, 0.0 }
 0x763   :  { %653 = vadd.xlane.f32.xlu0 %v652_v47  ;;  %703 = vmatpush1.bf16.msra.mxu0 %v1066_v48 }
 0x7ee   :  { %v651_v51 = vpop.xlane.xlu1 %650 }
 0x7ef   :  { %v655_v52 = vmul.f32 0.03125, %v651_v51 }
 0x7f0   :  { %v654_v53 = vpop.xlane.xlu0 %653 }
 0x7f1   :  { %v657_v54 = vadd.f32 1e-05, %v655_v52  ;;  %v656_v55 = vmul.f32 0.03125, %v654_v53 }
 0x7f3   :  { %1087 = vrsqrt.f32 %v657_v54  ;;  %v658_v31 = vadd.f32 1e-05, %v656_v55 }
 0x7f5   :  { %1089 = vrsqrt.f32 %v658_v31 }
 0x7fd   :  { %v1088_v35 = vpop.eup %1087 }
 0x7fe   :  { %v661_v56 = vmul.f32 %v1088_v35, %v1541_v39 }
 0x7ff   :  { %v1090_v57 = vpop.eup %1089 }
 0x800   :  { %v662_v59 = vmul.f32 %v1090_v57, %v1544_v42  ;;  %v670_v60 = vmul.f32 %v911_v58, %v661_v56 }
 0x802   :  { %v671_v61 = vmul.f32 %v911_v58, %v662_v59 }
 0x804   :  { %v672_v62 = vpack.c.bf16 %v671_v61, %v670_v60 }
 0x806   :  { %916 = vmatmul.mubr.msk.bf16.vlgmr.msra.gmra.mrb[12].mxu0 %vm112_vm0, %v672_v62 }
 0x8d9   :  { %v734_v8 = vpop.f32.mrb[12].mxu0 }
 0x8da   :  { %761 = vrot.lane.b32.xlu0 %v734_v8, %s1251_s7  ;;  %v736_v13 = vpop.f32.mrb[13].mxu0  ;;  %v917_v16 = vmul.f32 -1.442695, %v734_v8 }
 0x8db   :  { %763 = vrot.lane.b32.xlu1 %v736_v13, %s1251_s7  ;;  %v738_v14 = vpop.f32.mrb[14].mxu0 }
 0x8dc   :  { %v740_v15 = vpop.f32.mrb[15].mxu0  ;;  %v918_v17 = vmul.f32 -1.442695, %v738_v14  ;;  %1091 = vpow2.f32 %v917_v16 }
 0x8de   :  { %767 = vrot.lane.b32.xlu0 %v740_v15, %s1251_s7  ;;  %1093 = vpow2.f32 %v918_v17 }
 0x8df   :  { %765 = vrot.lane.b32.xlu1 %v738_v14, %s1251_s7  ;;  %s878_s7 = sshll.u32 %s1259_s10, 4  ;;  %s879_s7 = int_to_ptr.vmem [resolvable:$true] %s878_s7 }
 0x8e0   :  { %s1209_s23 = scalar_lea.vmem %s879_s7, 256  ;;  %p1214_p13 = scmp.lt.s32.totalorder %s879_s7, %s879_s7 }
 0x8e1   :  { %p1210_p12 = scmp.ne.s32.totalorder %s879_s7, %s1209_s23  ;;  %p1215_p0 = scmp.lt.s32.totalorder %s1209_s23, %s1209_s23 }
 0x8e3   :  { %p1216_p1 = por %p1215_p0, %p1214_p13 }
 0x8e5   :  { %p1217_p2 = pnand %p1216_p1, %p1210_p12 }
 0x8e6   :  { %v1092_v7 = vpop.eup %1091 }
 0x8e7   :  { %v749_v19 = vadd.f32 1.0, %v1092_v7 }
 0x8e8   :  { %v1094_v18 = vpop.eup %1093 }
 0x8e9   :  { %v750_v20 = vadd.f32 1.0, %v1094_v18  ;;  %1095 = vrcp.f32 %v749_v19 }
 0x8eb   :  { %1097 = vrcp.f32 %v750_v20 }
 0x8f3   :  { %v1096_v22 = vpop.eup %1095 }
 0x8f4   :  { %v755_v26 = vmul.f32 %v1096_v22, %v734_v8 }
 0x8f5   :  { %v1098_v24 = vpop.eup %1097 }
 0x8f6   :  { %v756_v27 = vmul.f32 %v1098_v24, %v738_v14 }
 0x94c   :  { %v762_v21 = vpop.permute.xlu0 %761 }
 0x94d   :  { %v764_v23 = vpop.permute.xlu1 %763 }
 0x94e   :  { %v769_v25 = vsel %vm112_vm0, %v762_v21, %v764_v23 }
 0x94f   :  { %v773_v11 = vmul.f32 %v769_v25, %v755_v26 }
 0x950   :  { %v768_v9 = vpop.permute.xlu0 %767 }
 0x951   :  { %v766_v10 = vpop.permute.xlu1 %765 }
 0x952   :  { %v770_v12 = vsel %vm112_vm0, %v766_v10, %v768_v9 }
 0x953   :  { %v774_v28 = vmul.f32 %v770_v12, %v756_v27 }
 0x955   :  { %v775_v29 = vpack.c.bf16 %v774_v28, %v773_v11 }
 0x957   :  { %1000 = vmatmul.mubr.msk.bf16.vlgmr.msra.gmra.mrb[8].mxu1 %vm824_vm6, %v775_v29 }
 0xa2a   :  { %v862_v30 = vpop.f32.mrb[8].mxu1 }
 0xa2b   :  { %v869_v32 = vadd.f32 %v862_v30, %v1541_v39  ;;  %v1001_v33 = vpop.f32.mrb[9].mxu1 }
 0xa2c   :  { %v865_v34 = vpop.f32.mrb[10].mxu1 }
 0xa2d   :  { %871 = vst.msk [vmem:[#allocation11] sm:$0xff] %vm112_vm0, %v869_v32  ;;  %v870_v36 = vadd.f32 %v865_v34, %v1544_v42  ;;  %v1002_v37 = vpop.f32.mrb[11].mxu1 }
 0xa2f   :  { %872 = vst.msk [vmem:[#allocation11 + $0x8] sm:$0xff] %vm112_vm0, %v870_v36 }
 0xa30   :  { %1220 = shalt.err (!%p1217_p2)
}
 0xa31   :  { %s1221_s6 = scalar_lea.hbm %s1629_s11, 256 }
 0xa32   :  { %p1222_p3 = scmp.ne.s32.totalorder %s1629_s11, %s1221_s6  ;;  %p1225_p4 = scmp.lt.u32.totalorder %s1221_s6, %s1629_s11 }
 0xa34   :  { %p1227_p5 = pnand %p1225_p4, %p1222_p3 }
 0xa36   :  { %1230 = shalt.err (!%p1227_p5)
}
 0xa37   :  { %884 = dma.vmem_to_hbm [thread:$0]  %s879_s7, 256, %s1629_s11, [#allocation4], %s1241_s29, %s1241_s29, %s1242_s30  }
 0xa38   :  { %1237 = dma.done.wait [#allocation4], 256  }
 0xa39   :  { %1238 = vsyncadd [#allocation4], 4294967040 }
 0xa3a   :  { %888 = vsyncpa [#allocation3], 1 }
 0xa3b   :  { %889 = vsyncpa [#allocation6], 1 }
 0xa3c   :  { %890 = vsyncpa [#allocation9], 1 }
 0xa3d   :  { %891 = vsyncpa [#allocation4], 1 }

</bundles_post_ra>
